<compile_context>
chip_gen: v6e
topology: v6e:2x2x1
jax: 0.10.0
libtpu: 0.0.40
codegen_flags: <defaults>
</compile_context>

<pallas_src>
import jax
import jax.numpy as jnp
from jax import lax
from jax.experimental import pallas as pl
from jax.experimental.pallas import tpu as pltpu

_LANES = 128
_SUBLANES = 8
_CHUNK_ROWS = 512                       # in-kernel accumulation chunk (rows)
_TARGET_BLOCK_BYTES = 4 * 1024 * 1024   # per operand, per pipeline buffer
_VMEM_LIMIT_BYTES = 32 * 1024 * 1024    # 16 MiB input buffers + headroom (fits all gens)


def _round_up(x, m):
    return ((x + m - 1) // m) * m


def _is_v7x():
    # v7x is the only targeted generation with 2 TensorCores per chip.
    try:
        kind = jax.devices()[0].device_kind.lower()
    except Exception:
        return False
    return ("v7" in kind) or ("tpu7" in kind)


def _make_l1_kernel(rows, block_rows, blocks_per_core, num_splits):
    full_chunks = block_rows // _CHUNK_ROWS
    rem_rows = block_rows - full_chunks * _CHUNK_ROWS   # multiple of 8, possibly 0

    def kernel(fake_ref, real_ref, out_ref, acc_ref):
        if num_splits > 1:
            c = pl.program_id(0)     # core split ("parallel")
            j = pl.program_id(1)     # block within this core's range (reduction)
            last_j = pl.num_programs(1) - 1
        else:
            c = 0
            j = pl.program_id(0)
            last_j = pl.num_programs(0) - 1

        @pl.when(j == 0)
        def _():
            acc_ref[...] = jnp.zeros_like(acc_ref)

        row_start = (c * blocks_per_core + j) * block_rows

        def chunk_sum(r0_ds, nrows):
            # Unmasked hot path: sub, abs, add per vreg; widen to f32 in-kernel.
            d = (real_ref[pl.ds(r0_ds, nrows), :].astype(jnp.float32)
                 - fake_ref[pl.ds(r0_ds, nrows), :].astype(jnp.float32))
            return jnp.sum(
                jnp.abs(d).reshape(nrows // _SUBLANES, _SUBLANES, _LANES), axis=0)

        def chunk_sum_masked(r0, r0_ds, nrows):
            # Boundary / clamped block only.  jnp.where (not mask-multiply) so
            # uninitialized VMEM rows past `rows` cannot leak NaN.
            row_ids = (row_start + r0
                       + lax.broadcasted_iota(jnp.int32, (nrows, _LANES), 0))
            mask = row_ids < rows
            d = (real_ref[pl.ds(r0_ds, nrows), :].astype(jnp.float32)
                 - fake_ref[pl.ds(r0_ds, nrows), :].astype(jnp.float32))
            vals = jnp.where(mask, jnp.abs(d), 0.0)
            return jnp.sum(
                vals.reshape(nrows // _SUBLANES, _SUBLANES, _LANES), axis=0)

        # Mask hoisted out of the hot path: >99% of blocks take the unmasked branch.
        is_full = row_start + block_rows <= rows

        @pl.when(is_full)
        def _():
            acc = acc_ref[...]
            if full_chunks > 0:
                def body(g, a):
                    r0 = g * _CHUNK_ROWS
                    return a + chunk_sum(pl.multiple_of(r0, _CHUNK_ROWS), _CHUNK_ROWS)
                acc = lax.fori_loop(0, full_chunks, body, acc)
            if rem_rows > 0:
                acc = acc + chunk_sum(full_chunks * _CHUNK_ROWS, rem_rows)
            acc_ref[...] = acc

        @pl.when(jnp.logical_not(is_full))
        def _():
            acc = acc_ref[...]
            if full_chunks > 0:
                def body(g, a):
                    r0 = g * _CHUNK_ROWS
                    return a + chunk_sum_masked(
                        r0, pl.multiple_of(r0, _CHUNK_ROWS), _CHUNK_ROWS)
                acc = lax.fori_loop(0, full_chunks, body, acc)
            if rem_rows > 0:
                r0 = full_chunks * _CHUNK_ROWS
                acc = acc + chunk_sum_masked(r0, r0, rem_rows)
            acc_ref[...] = acc

        @pl.when(j == last_j)
        def _():
            out_ref[0] = acc_ref[...]

    return kernel


def _sum_abs_diff_2d(fake2d, real2d):
    """Pallas reduction: sum(|real - fake|) over a (rows, 128) slab (f32 accum)."""
    rows = fake2d.shape[0]
    itemsize = max(jnp.dtype(fake2d.dtype).itemsize, jnp.dtype(real2d.dtype).itemsize)
    # Dtype-aware block: ~4 MiB per operand per buffer (8192 rows f32, 16384 bf16).
    max_rows = max(_SUBLANES,
                   (_TARGET_BLOCK_BYTES // (_LANES * itemsize)) // _SUBLANES * _SUBLANES)
    block_rows = min(max_rows, _round_up(rows, _SUBLANES))
    num_blocks = -(-rows // block_rows)                  # ceil-div: no dropped blocks

    # v7x (2 TCs/chip): give each TensorCore its own row range + accumulator.
    # Single-TC generations use a flat grid (no clamp, no redundant block).
    num_splits = 2 if (_is_v7x() and num_blocks >= 2) else 1
    blocks_per_core = -(-num_blocks // num_splits)

    kernel = _make_l1_kernel(rows, block_rows, blocks_per_core, num_splits)

    n_elems = rows * _LANES
    cost = pl.CostEstimate(
        flops=3 * n_elems,
        transcendentals=0,
        bytes_accessed=(n_elems * (jnp.dtype(fake2d.dtype).itemsize
                                   + jnp.dtype(real2d.dtype).itemsize)
                        + num_splits * _SUBLANES * _LANES * 4),
    )

    if num_splits == 1:
        grid = (num_blocks,)
        in_map = lambda j: (j, 0)
        out_map = lambda j: (0, 0, 0)
        dim_sem = ("arbitrary",)
    else:
        grid = (num_splits, blocks_per_core)

        def in_map(c, j):
            # Clamp so a block index past the array reuses the last valid block's
            # data; the in-kernel masked path zeroes its contribution.
            return (jnp.minimum(c * blocks_per_core + j, num_blocks - 1), 0)

        out_map = lambda c, j: (c, 0, 0)
        # NOTE(perf review, v7x): "parallel" is the documented megacore sharding.
        # If a profile shows one TensorCore idle, switch this to
        # (pltpu.CORE_PARALLEL, pltpu.ARBITRARY).
        dim_sem = ("parallel", "arbitrary")

    partials = pl.pallas_call(
        kernel,
        out_shape=jax.ShapeDtypeStruct((num_splits, _SUBLANES, _LANES), jnp.float32),
        grid_spec=pltpu.PrefetchScalarGridSpec(
            num_scalar_prefetch=0,
            grid=grid,
            in_specs=[
                pl.BlockSpec((block_rows, _LANES), in_map),
                pl.BlockSpec((block_rows, _LANES), in_map),
            ],
            out_specs=pl.BlockSpec((1, _SUBLANES, _LANES), out_map),
            scratch_shapes=[pltpu.VMEM((_SUBLANES, _LANES), jnp.float32)],
        ),
        compiler_params=pltpu.CompilerParams(
            dimension_semantics=dim_sem,
            vmem_limit_bytes=_VMEM_LIMIT_BYTES,
        ),
        cost_estimate=cost,
    )(fake2d, real2d)
    return jnp.sum(partials)


def l1_loss(fake, real):
    """JAX equivalent of L1.forward(fake, real). Inputs are NCHW."""
    if fake.shape != real.shape:
        # TODO(synk): bilinear upsample is wrapper glue (jax.image.resize), not a Pallas kernel.
        B, C = fake.shape[0], fake.shape[1]
        H, W = real.shape[2], real.shape[3]
        fake = jax.image.resize(fake, (B, C, H, W), method="bilinear")

    n = fake.size
    fake_flat = fake.reshape(-1)   # reshape of contiguous NCHW: no HBM copy
    real_flat = real.reshape(-1)
    rows = -(-n // _LANES)
    padded = rows * _LANES
    if padded != n:
        # Single zero-pad of the ragged tail (|0 - 0| = 0 contributes nothing);
        # avoids hidden prefix-slice copies and a second tiny reduction.
        fake_flat = jnp.pad(fake_flat, (0, padded - n))
        real_flat = jnp.pad(real_flat, (0, padded - n))

    total = _sum_abs_diff_2d(fake_flat.reshape(rows, _LANES),
                             real_flat.reshape(rows, _LANES))

    # 10x scale folded into the final scalar instead of the per-element hot path.
    return 10.0 * total / jnp.float32(n)


if __name__ == "__main__":
    key = jax.random.PRNGKey(0)
    k1, k2, k3, k4 = jax.random.split(key, 4)

    # Small NCHW shapes: batch=2, channels=4, spatial=16x16.
    fake = jax.random.normal(k1, (2, 4, 16, 16), dtype=jnp.float32)
    real = jax.random.normal(k2, (2, 4, 16, 16), dtype=jnp.float32)
    loss = l1_loss(fake, real)
    jax.block_until_ready(loss)
    ref = jnp.mean(jnp.abs(10.0 * real - 10.0 * fake))
    assert jnp.allclose(loss, ref, rtol=1e-5, atol=1e-5), (loss, ref)

    # Ragged case (sub-128 tail, rows not a multiple of 8): exercises the
    # single-pad path and the masked boundary block.
    fake_r = jax.random.normal(k3, (1, 3, 7, 19), dtype=jnp.float32)
    real_r = jax.random.normal(k4, (1, 3, 7, 19), dtype=jnp.float32)
    loss_r = l1_loss(fake_r, real_r)
    jax.block_until_ready(loss_r)
    ref_r = jnp.mean(jnp.abs(10.0 * real_r - 10.0 * fake_r))
    assert jnp.allclose(loss_r, ref_r, rtol=1e-5, atol=1e-5), (loss_r, ref_r)

    # bf16 inputs exercise the dtype-aware block sizing + in-kernel widening.
    fake_b = fake.astype(jnp.bfloat16)
    real_b = real.astype(jnp.bfloat16)
    loss_b = l1_loss(fake_b, real_b)
    jax.block_until_ready(loss_b)
    ref_b = jnp.mean(jnp.abs(10.0 * real_b.astype(jnp.float32)
                             - 10.0 * fake_b.astype(jnp.float32)))
    assert jnp.allclose(loss_b, ref_b, rtol=1e-4, atol=1e-4), (loss_b, ref_b)

    # Shape-mismatch (bilinear upsample) path.
    fake_small = jax.random.normal(k1, (2, 4, 8, 8), dtype=jnp.float32)
    loss2 = l1_loss(fake_small, real)
    jax.block_until_ready(loss2)

    print("KERNEL_OK")
</pallas_src>

<mosaic_0001>
module attributes {stable_mosaic.version = 11 : i64} {
  func.func @kernel(%arg0: i32, %arg1: memref<16x128xf32, #tpu.memory_space<vmem>>, %arg2: memref<16x128xf32, #tpu.memory_space<vmem>>, %arg3: memref<1x8x128xf32, #tpu.memory_space<vmem>>, %arg4: memref<8x128xf32, #tpu.memory_space<vmem>>) attributes {dimension_semantics = [#tpu.dimension_semantics<arbitrary>], iteration_bounds = array<i64: 1>, scalar_prefetch = 0 : i64, scratch_operands = 1 : i64, tpu.core_type = #tpu.core_type<tc>, window_params = [{transform_indices = @transform_0, window_bounds = array<i64: 16, 128>}, {transform_indices = @transform_1, window_bounds = array<i64: 16, 128>}, {pipeline_mode = #tpu.pipeline_mode<synchronous>, transform_indices = @transform_2, window_bounds = array<i64: 1, 8, 128>}]} {
    %c0_i32 = arith.constant 0 : i32
    %0 = arith.cmpi eq, %arg0, %c0_i32 : i32
    %1 = arith.extui %0 : i1 to i32
    %c0_i32_0 = arith.constant 0 : i32
    %2 = arith.cmpi ne, %1, %c0_i32_0 : i32
    scf.if %2 {
      %cst = arith.constant 0.000000e+00 : f32
      %15 = vector.broadcast %cst : f32 to vector<8x128xf32>
      %c0 = arith.constant 0 : index
      %c0_8 = arith.constant 0 : index
      %16 = vector.load %arg4[%c0, %c0_8] : memref<8x128xf32, #tpu.memory_space<vmem>>, vector<8x128xf32>
      tpu.vector_store %arg4[%c0, %c0_8], %15 {strides = array<i32>} : memref<8x128xf32, #tpu.memory_space<vmem>>, vector<8x128xf32>,
    } else {
    }
    %c0_i32_1 = arith.constant 0 : i32
    %3 = arith.addi %c0_i32_1, %arg0 : i32
    %c16_i32 = arith.constant 16 : i32
    %4 = arith.muli %3, %c16_i32 : i32
    %c16_i32_2 = arith.constant 16 : i32
    %5 = arith.addi %4, %c16_i32_2 : i32
    %c16_i32_3 = arith.constant 16 : i32
    %6 = arith.cmpi sle, %5, %c16_i32_3 : i32
    %7 = arith.extui %6 : i1 to i32
    %c0_i32_4 = arith.constant 0 : i32
    %8 = arith.cmpi ne, %7, %c0_i32_4 : i32
    scf.if %8 {
      %c0 = arith.constant 0 : index
      %c0_8 = arith.constant 0 : index
      %15 = vector.load %arg4[%c0, %c0_8] : memref<8x128xf32, #tpu.memory_space<vmem>>, vector<8x128xf32>
      %c0_9 = arith.constant 0 : index
      %c0_10 = arith.constant 0 : index
      %16 = vector.load %arg2[%c0_9, %c0_10] : memref<16x128xf32, #tpu.memory_space<vmem>>, vector<16x128xf32>
      %c0_11 = arith.constant 0 : index
      %c0_12 = arith.constant 0 : index
      %17 = vector.load %arg1[%c0_11, %c0_12] : memref<16x128xf32, #tpu.memory_space<vmem>>, vector<16x128xf32>
      %18 = arith.subf %16, %17 : vector<16x128xf32>
      %19 = math.absf %18 : vector<16x128xf32>
      %20 = vector.shape_cast %19 : vector<16x128xf32> to vector<2x8x128xf32>
      %cst = arith.constant dense<0.000000e+00> : vector<8x128xf32>
      %21 = vector.multi_reduction <add>, %20, %cst [0] : vector<2x8x128xf32> to vector<8x128xf32>
      %22 = arith.addf %15, %21 : vector<8x128xf32>
      %c0_13 = arith.constant 0 : index
      %c0_14 = arith.constant 0 : index
      %23 = vector.load %arg4[%c0_13, %c0_14] : memref<8x128xf32, #tpu.memory_space<vmem>>, vector<8x128xf32>
      tpu.vector_store %arg4[%c0_13, %c0_14], %22 {strides = array<i32>} : memref<8x128xf32, #tpu.memory_space<vmem>>, vector<8x128xf32>,
    } else {
    }
    %true = arith.constant true
    %9 = arith.xori %6, %true : i1
    %10 = arith.extui %9 : i1 to i32
    %c0_i32_5 = arith.constant 0 : i32
    %11 = arith.cmpi ne, %10, %c0_i32_5 : i32
    scf.if %11 {
      %c0 = arith.constant 0 : index
      %c0_8 = arith.constant 0 : index
      %15 = vector.load %arg4[%c0, %c0_8] : memref<8x128xf32, #tpu.memory_space<vmem>>, vector<8x128xf32>
      %c0_i32_9 = arith.constant 0 : i32
      %16 = arith.addi %4, %c0_i32_9 : i32
      %17 = tpu.iota {dimensions = array<i32: 0>} : vector<16x128xi32>
      %18 = vector.broadcast %16 : i32 to vector<16x128xi32>
      %19 = arith.addi %18, %17 : vector<16x128xi32>
      %c16_i32_10 = arith.constant 16 : i32
      %20 = vector.broadcast %c16_i32_10 : i32 to vector<16x128xi32>
      %21 = arith.cmpi slt, %19, %20 : vector<16x128xi32>
      %c0_11 = arith.constant 0 : index
      %c0_12 = arith.constant 0 : index
      %22 = vector.load %arg2[%c0_11, %c0_12] : memref<16x128xf32, #tpu.memory_space<vmem>>, vector<16x128xf32>
      %c0_13 = arith.constant 0 : index
      %c0_14 = arith.constant 0 : index
      %23 = vector.load %arg1[%c0_13, %c0_14] : memref<16x128xf32, #tpu.memory_space<vmem>>, vector<16x128xf32>
      %24 = arith.subf %22, %23 : vector<16x128xf32>
      %25 = math.absf %24 : vector<16x128xf32>
      %cst = arith.constant 0.000000e+00 : f32
      %26 = vector.broadcast %cst : f32 to vector<16x128xf32>
      %27 = arith.select %21, %25, %26 : vector<16x128xi1>, vector<16x128xf32>
      %28 = vector.shape_cast %27 : vector<16x128xf32> to vector<2x8x128xf32>
      %cst_15 = arith.constant dense<0.000000e+00> : vector<8x128xf32>
      %29 = vector.multi_reduction <add>, %28, %cst_15 [0] : vector<2x8x128xf32> to vector<8x128xf32>
      %30 = arith.addf %15, %29 : vector<8x128xf32>
      %c0_16 = arith.constant 0 : index
      %c0_17 = arith.constant 0 : index
      %31 = vector.load %arg4[%c0_16, %c0_17] : memref<8x128xf32, #tpu.memory_space<vmem>>, vector<8x128xf32>
      tpu.vector_store %arg4[%c0_16, %c0_17], %30 {strides = array<i32>} : memref<8x128xf32, #tpu.memory_space<vmem>>, vector<8x128xf32>,
    } else {
    }
    %c0_i32_6 = arith.constant 0 : i32
    %12 = arith.cmpi eq, %arg0, %c0_i32_6 : i32
    %13 = arith.extui %12 : i1 to i32
    %c0_i32_7 = arith.constant 0 : i32
    %14 = arith.cmpi ne, %13, %c0_i32_7 : i32
    scf.if %14 {
      %c0 = arith.constant 0 : index
      %c0_8 = arith.constant 0 : index
      %15 = vector.load %arg4[%c0, %c0_8] : memref<8x128xf32, #tpu.memory_space<vmem>>, vector<8x128xf32>
      %c0_9 = arith.constant 0 : index
      %c0_10 = arith.constant 0 : index
      %c0_11 = arith.constant 0 : index
      %16 = vector.load %arg3[%c0_9, %c0_10, %c0_11] : memref<1x8x128xf32, #tpu.memory_space<vmem>>, vector<1x8x128xf32>
      %17 = vector.shape_cast %16 : vector<1x8x128xf32> to vector<8x128xf32>
      %18 = vector.shape_cast %15 : vector<8x128xf32> to vector<1x8x128xf32>
      tpu.vector_store %arg3[%c0_9, %c0_10, %c0_11], %18 {strides = array<i32>} : memref<1x8x128xf32, #tpu.memory_space<vmem>>, vector<1x8x128xf32>,
    } else {
    }
    return
  }
  func.func @transform_0(%arg0: i32) -> (i32, i32) {
    %c0_i32 = arith.constant 0 : i32
    %c0_i32_0 = arith.constant 0 : i32
    return %arg0, %c0_i32 : i32, i32
  }
  func.func @transform_1(%arg0: i32) -> (i32, i32) {
    %c0_i32 = arith.constant 0 : i32
    %c0_i32_0 = arith.constant 0 : i32
    return %arg0, %c0_i32 : i32, i32
  }
  func.func @transform_2(%arg0: i32) -> (i32, i32, i32) {
    %c0_i32 = arith.constant 0 : i32
    %c0_i32_0 = arith.constant 0 : i32
    %c0_i32_1 = arith.constant 0 : i32
    %c0_i32_2 = arith.constant 0 : i32
    return %c0_i32, %c0_i32_0, %c0_i32_1 : i32, i32, i32
  }
}

</mosaic_0001>

<bundles_post_ra>
// kernel: tpu_custom_call.1
= control target key start
LH: loop header
LB: loop body
LE: loop exit
PB: predicated region body
PF: predicated region fallthrough
CT: control target
= control target key end

     0   :  { %7 = vsyncpa [#allocation4], 0  ;;  %s210_s0 = inlined_call_operand.hbm [shape: f32[16,128], index: 0, kind: input, shape index: {}]   ;;  %s211_s1 = inlined_call_operand.hbm [shape: f32[16,128], index: 1, kind: input, shape index: {}]   ;;  %s212_s2 = inlined_call_operand.hbm [shape: f32[1,8,128], index: 2, kind: output, shape index: {}]  }
   0x1   :  { %8 = vsyncpa [#allocation7], 0 }
   0x2   :  { %9 = vsyncpa [#allocation5], 0  ;;  %s181_s9 = smov [#allocation3]  }
   0x3   :  { %s15_s10 = sshll.u32 %s181_s9, 4  ;;  %s16_s10 = int_to_ptr.vmem [resolvable:$true] %s15_s10 }
   0x4   :  { %s123_s11 = scalar_lea.vmem %s16_s10, 256  ;;  %p128_p1 = scmp.lt.s32.totalorder %s16_s10, %s16_s10 }
   0x5   :  { %p124_p0 = scmp.ne.s32.totalorder %s16_s10, %s123_s11  ;;  %p129_p2 = scmp.lt.s32.totalorder %s123_s11, %s123_s11 }
   0x7   :  { %p130_p3 = por %p129_p2, %p128_p1 }
   0x9   :  { %p131_p4 = pnand %p130_p3, %p124_p0 }
   0xb   :  { %134 = shalt.err (!%p131_p4)
}
   0xc   :  { %s182_s12 = smov 128   ;;  %s183_s13 = smov 8  }
   0xd   :  { %21 = dma.hbm_to_vmem [thread:$0]  %s210_s0, 256, %s16_s10, [#allocation4], %s182_s12, %s182_s12, %s183_s13  }
   0xe   :  { %s184_s16 = smov [#allocation6]  }
   0xf   :  { %s27_s17 = sshll.u32 %s184_s16, 4  ;;  %s28_s17 = int_to_ptr.vmem [resolvable:$true] %s27_s17 }
  0x10   :  { %s143_s18 = scalar_lea.vmem %s28_s17, 256  ;;  %p148_p6 = scmp.lt.s32.totalorder %s28_s17, %s28_s17 }
  0x11   :  { %p144_p5 = scmp.ne.s32.totalorder %s28_s17, %s143_s18  ;;  %p149_p7 = scmp.lt.s32.totalorder %s143_s18, %s143_s18 }
  0x13   :  { %p150_p8 = por %p149_p7, %p148_p6 }
  0x15   :  { %p151_p9 = pnand %p150_p8, %p144_p5 }
  0x17   :  { %154 = shalt.err (!%p151_p9)
}
  0x18   :  { %33 = dma.hbm_to_vmem [thread:$0]  %s211_s1, 256, %s28_s17, [#allocation7], %s182_s12, %s182_s12, %s183_s13  }
  0x19   :  { %175 = dma.done.wait [#allocation4], 256  }
  0x1a   :  { %176 = vsyncadd [#allocation4], 4294967040 }
  0x1b   :  { %177 = dma.done.wait [#allocation7], 256  }
  0x1c   :  { %178 = vsyncadd [#allocation7], 4294967040  ;;  %v52_v0 = vld [vmem:[#allocation6] sm:$0xff]  ;;  %v53_v1 = vld [vmem:[#allocation6 + $0x8] sm:$0xff]  ;;  %s185_s0 = smov [#allocation8]  }
  0x1d   :  { %v54_v2 = vld [vmem:[#allocation3] sm:$0xff]  ;;  %v55_v3 = vld [vmem:[#allocation3 + $0x8] sm:$0xff]  ;;  %s100_s21 = sshll.u32 %s185_s0, 4  ;;  %s101_s21 = int_to_ptr.vmem [resolvable:$true] %s100_s21 }
  0x1e   :  { %v56_v4 = vsub.f32 %v52_v0, %v54_v2  ;;  %v57_v5 = vsub.f32 %v53_v1, %v55_v3  ;;  %s155_s22 = scalar_lea.vmem %s101_s21, 128  ;;  %p160_p11 = scmp.lt.s32.totalorder %s101_s21, %s101_s21 }
  0x1f   :  { %p156_p10 = scmp.ne.s32.totalorder %s101_s21, %s155_s22  ;;  %p161_p12 = scmp.lt.s32.totalorder %s155_s22, %s155_s22 }
  0x20   :  { %v58_v6 = vand.u32 2147483647, %v56_v4  ;;  %v59_v7 = vand.u32 2147483647, %v57_v5 }
  0x21   :  { %p162_p13 = por %p161_p12, %p160_p11 }
  0x22   :  { %v60_v8 = vadd.f32 %v59_v7, %v58_v6 }
  0x23   :  { %p163_p0 = pnand %p162_p13, %p156_p10 }
  0x24   :  { %93 = vst [vmem:[#allocation8] sm:$0xff] %v60_v8 }
  0x25   :  { %166 = shalt.err (!%p163_p0)
}
  0x26   :  { %103 = dma.vmem_to_hbm [thread:$0]  %s101_s21, 128, %s212_s2, [#allocation5]  }
  0x27   :  { %179 = dma.done.wait [#allocation5], 128  }
  0x28   :  { %180 = vsyncadd [#allocation5], 4294967168 }
  0x29   :  { %107 = vsyncpa [#allocation4], 1 }
  0x2a   :  { %108 = vsyncpa [#allocation7], 1 }
  0x2b   :  { %109 = vsyncpa [#allocation5], 1 }

</bundles_post_ra>
